<compile_context>
chip_gen: v6e
topology: v6e:2x2x1
jax: 0.10.0
libtpu: 0.0.40
codegen_flags: <defaults>
</compile_context>

<pallas_src>
import jax
import jax.numpy as jnp
from jax.experimental import pallas as pl
from jax.experimental.pallas import tpu as pltpu

LANE = 128
SUBLANE = 8


def _round_up(n, m):
    return ((n + m - 1) // m) * m


def _pad2d(a, rows, cols):
    return jnp.pad(a, ((0, rows - a.shape[0]), (0, cols - a.shape[1])))


def ppo_actor_kernel(x_ref, w1_ref, b1_ref, w2_ref, b2_ref, w3_ref, b3_ref,
                     o_ref):
    """Fused MLP forward: two tanh hidden layers + linear output head.

    Matmul operands may be bf16 (MXU fast path); accumulation, bias add and
    tanh are in f32.
    """
    x = x_ref[...]

    h1 = jnp.tanh(
        jnp.dot(x, w1_ref[...], preferred_element_type=jnp.float32)
        + b1_ref[...])
    h2 = jnp.tanh(
        jnp.dot(h1.astype(w2_ref.dtype), w2_ref[...],
                preferred_element_type=jnp.float32)
        + b2_ref[...])
    logits = (
        jnp.dot(h2.astype(w3_ref.dtype), w3_ref[...],
                preferred_element_type=jnp.float32)
        + b3_ref[...])

    o_ref[...] = logits.astype(o_ref.dtype)


def ppo_actor_forward(x, params, *, block_batch=None, use_bf16=True,
                      vmem_limit_bytes=32 * 1024 * 1024):
    """Invoke the fused Pallas kernel.

    x:      (batch, input_dim) float32
    params: dict with w1 (in,h), b1 (1,h), w2 (h,h), b2 (1,h),
            w3 (h,out), b3 (1,out)   -- weights are (in, out) layout so the
            kernel computes y = x @ W + b directly on the MXU.
    """
    w1, b1 = params["w1"], params["b1"]
    w2, b2 = params["w2"], params["b2"]
    w3, b3 = params["w3"], params["b3"]

    batch, input_dim = x.shape
    hidden_dim = w1.shape[1]
    output_dim = w3.shape[1]

    h_pad = _round_up(hidden_dim, LANE)
    o_pad = _round_up(output_dim, LANE)

    compute_dtype = jnp.bfloat16 if use_bf16 else jnp.float32

    # Zero-pad lane dims to 128; padded weight rows/cols and bias entries are
    # zero so the extra hidden/output columns never contaminate real outputs.
    w1p = _pad2d(w1, input_dim, h_pad).astype(compute_dtype)
    b1p = _pad2d(b1, 1, h_pad).astype(jnp.float32)
    w2p = _pad2d(w2, h_pad, h_pad).astype(compute_dtype)
    b2p = _pad2d(b2, 1, h_pad).astype(jnp.float32)
    w3p = _pad2d(w3, h_pad, o_pad).astype(compute_dtype)
    b3p = _pad2d(b3, 1, o_pad).astype(jnp.float32)

    # Batch tile: sublane-aligned, capped for double-buffer VMEM headroom.
    # (On v7x, with its 64 MiB VMEM, keep custom tiles <= ~4096 rows.)
    if block_batch is None:
        block_batch = min(512, _round_up(batch, SUBLANE))
    block_batch = _round_up(block_batch, SUBLANE)
    padded_batch = _round_up(batch, block_batch)

    xp = x.astype(compute_dtype)
    if padded_batch != batch:
        xp = jnp.pad(xp, ((0, padded_batch - batch), (0, 0)))

    grid = (padded_batch // block_batch,)

    def resident(shape):
        # Weights/biases: same block every grid step -> stay VMEM-resident.
        return pl.BlockSpec(shape, lambda i: (0, 0))

    in_specs = [
        pl.BlockSpec((block_batch, input_dim), lambda i: (i, 0)),  # streamed x
        resident((input_dim, h_pad)),
        resident((1, h_pad)),
        resident((h_pad, h_pad)),
        resident((1, h_pad)),
        resident((h_pad, o_pad)),
        resident((1, o_pad)),
    ]
    out_specs = pl.BlockSpec((block_batch, o_pad), lambda i: (i, 0))

    out_padded = pl.pallas_call(
        ppo_actor_kernel,
        out_shape=jax.ShapeDtypeStruct((padded_batch, o_pad), jnp.float32),
        grid=grid,
        in_specs=in_specs,
        out_specs=out_specs,
        compiler_params=pltpu.CompilerParams(
            dimension_semantics=("parallel",),
            vmem_limit_bytes=vmem_limit_bytes),
    )(xp, w1p, b1p, w2p, b2p, w3p, b3p)

    return out_padded[:batch, :output_dim]


def init_params(key, input_dim, hidden_dim, output_dim):
    """Deterministic synthetic init (PyTorch-style uniform fan-in bounds)."""
    ks = jax.random.split(key, 6)

    def uniform(k, shape, fan_in):
        bound = 1.0 / jnp.sqrt(fan_in)
        return jax.random.uniform(k, shape, jnp.float32, -bound, bound)

    return {
        "w1": uniform(ks[0], (input_dim, hidden_dim), input_dim),
        "b1": uniform(ks[1], (1, hidden_dim), input_dim),
        "w2": uniform(ks[2], (hidden_dim, hidden_dim), hidden_dim),
        "b2": uniform(ks[3], (1, hidden_dim), hidden_dim),
        "w3": uniform(ks[4], (hidden_dim, output_dim), hidden_dim),
        "b3": uniform(ks[5], (1, output_dim), hidden_dim),
    }


def reference_forward(x, params):
    """Plain-JAX f32 reference matching the PyTorch forward semantics."""
    h1 = jnp.tanh(x @ params["w1"] + params["b1"])
    h2 = jnp.tanh(h1 @ params["w2"] + params["b2"])
    return h2 @ params["w3"] + params["b3"]


if __name__ == "__main__":
    key = jax.random.PRNGKey(0)
    k_x, k_p, k_x2 = jax.random.split(key, 3)

    # Small shapes consistent with the module: PPO actor over a flat state.
    batch, input_dim, hidden_dim, output_dim = 8, 16, 32, 4

    x = jax.random.normal(k_x, (batch, input_dim), dtype=jnp.float32)
    params = init_params(k_p, input_dim, hidden_dim, output_dim)
    ref = reference_forward(x, params)

    # Exact-semantics path: f32 matmul operands.
    out_f32 = jax.block_until_ready(ppo_actor_forward(x, params, use_bf16=False))
    assert out_f32.shape == (batch, output_dim)
    assert jnp.allclose(out_f32, ref, atol=1e-4, rtol=1e-4), "f32 mismatch vs reference"

    # Optimized path: bf16 matmul operands, f32 accumulation / bias / tanh.
    out_bf16 = jax.block_until_ready(ppo_actor_forward(x, params, use_bf16=True))
    assert out_bf16.shape == (batch, output_dim)
    assert jnp.allclose(out_bf16, ref, atol=5e-2, rtol=5e-2), "bf16 mismatch vs reference"

    # Multi-step grid with a ragged batch (padded in the wrapper, sliced back).
    big_batch = 300
    x_big = jax.random.normal(k_x2, (big_batch, input_dim), dtype=jnp.float32)
    ref_big = reference_forward(x_big, params)
    out_big = jax.block_until_ready(
        ppo_actor_forward(x_big, params, use_bf16=True, block_batch=128))
    assert out_big.shape == (big_batch, output_dim)
    assert jnp.allclose(out_big, ref_big, atol=5e-2, rtol=5e-2), "ragged-batch mismatch"

    print("KERNEL_OK")
</pallas_src>

<mosaic_0001>
module attributes {stable_mosaic.version = 11 : i64} {
  func.func @ppo_actor_kernel(%arg0: i32, %arg1: memref<8x16xf32, #tpu.memory_space<vmem>>, %arg2: memref<16x128xf32, #tpu.memory_space<vmem>>, %arg3: memref<1x128xf32, #tpu.memory_space<vmem>>, %arg4: memref<128x128xf32, #tpu.memory_space<vmem>>, %arg5: memref<1x128xf32, #tpu.memory_space<vmem>>, %arg6: memref<128x128xf32, #tpu.memory_space<vmem>>, %arg7: memref<1x128xf32, #tpu.memory_space<vmem>>, %arg8: memref<8x128xf32, #tpu.memory_space<vmem>>) attributes {dimension_semantics = [#tpu.dimension_semantics<parallel>], iteration_bounds = array<i64: 1>, scalar_prefetch = 0 : i64, scratch_operands = 0 : i64, tpu.core_type = #tpu.core_type<tc>, window_params = [{transform_indices = @transform_0, window_bounds = array<i64: 8, 16>}, {pipeline_mode = #tpu.pipeline_mode<synchronous>, transform_indices = @transform_1, window_bounds = array<i64: 16, 128>}, {pipeline_mode = #tpu.pipeline_mode<synchronous>, transform_indices = @transform_2, window_bounds = array<i64: 1, 128>}, {pipeline_mode = #tpu.pipeline_mode<synchronous>, transform_indices = @transform_3, window_bounds = array<i64: 128, 128>}, {pipeline_mode = #tpu.pipeline_mode<synchronous>, transform_indices = @transform_4, window_bounds = array<i64: 1, 128>}, {pipeline_mode = #tpu.pipeline_mode<synchronous>, transform_indices = @transform_5, window_bounds = array<i64: 128, 128>}, {pipeline_mode = #tpu.pipeline_mode<synchronous>, transform_indices = @transform_6, window_bounds = array<i64: 1, 128>}, {transform_indices = @transform_7, window_bounds = array<i64: 8, 128>}]} {
    %c0 = arith.constant 0 : index
    %c0_0 = arith.constant 0 : index
    %0 = vector.load %arg1[%c0, %c0_0] : memref<8x16xf32, #tpu.memory_space<vmem>>, vector<8x16xf32>
    %c0_1 = arith.constant 0 : index
    %c0_2 = arith.constant 0 : index
    %1 = vector.load %arg2[%c0_1, %c0_2] : memref<16x128xf32, #tpu.memory_space<vmem>>, vector<16x128xf32>
    %cst = arith.constant dense<0.000000e+00> : vector<8x128xf32>
    %2 = tpu.matmul %0, %1, %cst {dimension_numbers = #tpu.dot_dimension_numbers<[1], [0], [0], [1], [0, 0, 1, 1], [], []>} : vector<8x16xf32>, vector<16x128xf32>, vector<8x128xf32> -> vector<8x128xf32>
    %c0_3 = arith.constant 0 : index
    %c0_4 = arith.constant 0 : index
    %3 = vector.load %arg3[%c0_3, %c0_4] : memref<1x128xf32, #tpu.memory_space<vmem>>, vector<1x128xf32>
    %4 = vector.broadcast %3 : vector<1x128xf32> to vector<8x128xf32>
    %5 = arith.addf %2, %4 : vector<8x128xf32>
    %6 = math.tanh %5 : vector<8x128xf32>
    %c0_5 = arith.constant 0 : index
    %c0_6 = arith.constant 0 : index
    %7 = vector.load %arg4[%c0_5, %c0_6] : memref<128x128xf32, #tpu.memory_space<vmem>>, vector<128x128xf32>
    %cst_7 = arith.constant dense<0.000000e+00> : vector<8x128xf32>
    %8 = tpu.matmul %6, %7, %cst_7 {dimension_numbers = #tpu.dot_dimension_numbers<[1], [0], [0], [1], [0, 0, 1, 1], [], []>} : vector<8x128xf32>, vector<128x128xf32>, vector<8x128xf32> -> vector<8x128xf32>
    %c0_8 = arith.constant 0 : index
    %c0_9 = arith.constant 0 : index
    %9 = vector.load %arg5[%c0_8, %c0_9] : memref<1x128xf32, #tpu.memory_space<vmem>>, vector<1x128xf32>
    %10 = vector.broadcast %9 : vector<1x128xf32> to vector<8x128xf32>
    %11 = arith.addf %8, %10 : vector<8x128xf32>
    %12 = math.tanh %11 : vector<8x128xf32>
    %c0_10 = arith.constant 0 : index
    %c0_11 = arith.constant 0 : index
    %13 = vector.load %arg6[%c0_10, %c0_11] : memref<128x128xf32, #tpu.memory_space<vmem>>, vector<128x128xf32>
    %cst_12 = arith.constant dense<0.000000e+00> : vector<8x128xf32>
    %14 = tpu.matmul %12, %13, %cst_12 {dimension_numbers = #tpu.dot_dimension_numbers<[1], [0], [0], [1], [0, 0, 1, 1], [], []>} : vector<8x128xf32>, vector<128x128xf32>, vector<8x128xf32> -> vector<8x128xf32>
    %c0_13 = arith.constant 0 : index
    %c0_14 = arith.constant 0 : index
    %15 = vector.load %arg7[%c0_13, %c0_14] : memref<1x128xf32, #tpu.memory_space<vmem>>, vector<1x128xf32>
    %16 = vector.broadcast %15 : vector<1x128xf32> to vector<8x128xf32>
    %17 = arith.addf %14, %16 : vector<8x128xf32>
    %c0_15 = arith.constant 0 : index
    %c0_16 = arith.constant 0 : index
    %18 = vector.load %arg8[%c0_15, %c0_16] : memref<8x128xf32, #tpu.memory_space<vmem>>, vector<8x128xf32>
    tpu.vector_store %arg8[%c0_15, %c0_16], %17 {strides = array<i32>} : memref<8x128xf32, #tpu.memory_space<vmem>>, vector<8x128xf32>,
    return
  }
  func.func @transform_0(%arg0: i32) -> (i32, i32) {
    %c0_i32 = arith.constant 0 : i32
    %c0_i32_0 = arith.constant 0 : i32
    return %arg0, %c0_i32 : i32, i32
  }
  func.func @transform_1(%arg0: i32) -> (i32, i32) {
    %c0_i32 = arith.constant 0 : i32
    %c0_i32_0 = arith.constant 0 : i32
    %c0_i32_1 = arith.constant 0 : i32
    return %c0_i32, %c0_i32_0 : i32, i32
  }
  func.func @transform_2(%arg0: i32) -> (i32, i32) {
    %c0_i32 = arith.constant 0 : i32
    %c0_i32_0 = arith.constant 0 : i32
    %c0_i32_1 = arith.constant 0 : i32
    return %c0_i32, %c0_i32_0 : i32, i32
  }
  func.func @transform_3(%arg0: i32) -> (i32, i32) {
    %c0_i32 = arith.constant 0 : i32
    %c0_i32_0 = arith.constant 0 : i32
    %c0_i32_1 = arith.constant 0 : i32
    return %c0_i32, %c0_i32_0 : i32, i32
  }
  func.func @transform_4(%arg0: i32) -> (i32, i32) {
    %c0_i32 = arith.constant 0 : i32
    %c0_i32_0 = arith.constant 0 : i32
    %c0_i32_1 = arith.constant 0 : i32
    return %c0_i32, %c0_i32_0 : i32, i32
  }
  func.func @transform_5(%arg0: i32) -> (i32, i32) {
    %c0_i32 = arith.constant 0 : i32
    %c0_i32_0 = arith.constant 0 : i32
    %c0_i32_1 = arith.constant 0 : i32
    return %c0_i32, %c0_i32_0 : i32, i32
  }
  func.func @transform_6(%arg0: i32) -> (i32, i32) {
    %c0_i32 = arith.constant 0 : i32
    %c0_i32_0 = arith.constant 0 : i32
    %c0_i32_1 = arith.constant 0 : i32
    return %c0_i32, %c0_i32_0 : i32, i32
  }
  func.func @transform_7(%arg0: i32) -> (i32, i32) {
    %c0_i32 = arith.constant 0 : i32
    %c0_i32_0 = arith.constant 0 : i32
    return %arg0, %c0_i32 : i32, i32
  }
}

</mosaic_0001>

<bundles_post_ra>
// kernel: tpu_custom_call.1
= control target key start
LH: loop header
LB: loop body
LE: loop exit
PB: predicated region body
PF: predicated region fallthrough
CT: control target
= control target key end

     0   :  { %12 = vsyncpa [#allocation3], 0  ;;  %s731_s0 = inlined_call_operand.hbm [shape: f32[8,16], index: 0, kind: input, shape index: {}]   ;;  %s732_s1 = inlined_call_operand.hbm [shape: f32[16,128], index: 1, kind: input, shape index: {}]   ;;  %s733_s2 = inlined_call_operand.vmem [shape: f32[1,128], index: 2, kind: input, shape index: {}]   ;;  %s734_s3 = inlined_call_operand.hbm [shape: f32[128,128], index: 3, kind: input, shape index: {}]   ;;  %s735_s4 = inlined_call_operand.vmem [shape: f32[1,128], index: 4, kind: input, shape index: {}]   ;;  %s736_s5 = inlined_call_operand.hbm [shape: f32[128,128], index: 5, kind: input, shape index: {}]   ;;  %s737_s6 = inlined_call_operand.vmem [shape: f32[1,128], index: 6, kind: input, shape index: {}]   ;;  %s738_s7 = inlined_call_operand.hbm [shape: f32[8,128], index: 7, kind: output, shape index: {}]  }
   0x1   :  { %13 = vsyncpa [#allocation6], 0 }
   0x2   :  { %14 = vsyncpa [#allocation9], 0 }
   0x3   :  { %15 = vsyncpa [#allocation4], 0  ;;  %s609_s24 = smov [#allocation5]  }
   0x4   :  { %s31_s25 = sshll.u32 %s609_s24, 4  ;;  %s32_s25 = int_to_ptr.vmem [resolvable:$true] %s31_s25 }
   0x5   :  { %s509_s26 = scalar_lea.vmem %s32_s25, 256  ;;  %p514_p1 = scmp.lt.s32.totalorder %s32_s25, %s32_s25 }
   0x6   :  { %p510_p0 = scmp.ne.s32.totalorder %s32_s25, %s509_s26  ;;  %p515_p2 = scmp.lt.s32.totalorder %s509_s26, %s509_s26 }
   0x8   :  { %p516_p3 = por %p515_p2, %p514_p1 }
   0xa   :  { %p517_p4 = pnand %p516_p3, %p510_p0 }
   0xc   :  { %520 = shalt.err (!%p517_p4)
}
   0xd   :  { %s610_s27 = smov 128   ;;  %s611_s28 = smov 8  }
   0xe   :  { %37 = dma.hbm_to_vmem [thread:$0]  %s732_s1, 256, %s32_s25, [#allocation6], %s610_s27, %s610_s27, %s611_s28  }
   0xf   :  { %s612_s8 = smov [#allocation2]   ;;  %s613_s10 = smov [#allocation7]  }
  0x10   :  { %s22_s9 = sshll.u32 %s612_s8, 4  ;;  %s45_s11 = sshll.u32 %s613_s10, 4  ;;  %s23_s9 = int_to_ptr.vmem [resolvable:$true] %s22_s9  ;;  %s46_s11 = int_to_ptr.vmem [resolvable:$true] %s45_s11 }
  0x11   :  { %s529_s12 = scalar_lea.vmem %s23_s9, 128  ;;  %p534_p6 = scmp.lt.s32.totalorder %s23_s9, %s23_s9 }
  0x12   :  { %p530_p5 = scmp.ne.s32.totalorder %s23_s9, %s529_s12  ;;  %p535_p7 = scmp.lt.s32.totalorder %s529_s12, %s529_s12 }
  0x14   :  { %p536_p8 = por %p535_p7, %p534_p6 }
  0x16   :  { %p537_p9 = pnand %p536_p8, %p530_p5 }
  0x18   :  { %540 = shalt.err (!%p537_p9)
}
  0x19   :  { %25 = dma.hbm_to_vmem [thread:$0]  %s731_s0, 128, %s23_s9, [#allocation3]  }
  0x1a   :  { %s549_s15 = scalar_lea.vmem %s46_s11, 2048  ;;  %p554_p11 = scmp.lt.s32.totalorder %s46_s11, %s46_s11 }
  0x1b   :  { %p550_p10 = scmp.ne.s32.totalorder %s46_s11, %s549_s15  ;;  %p555_p12 = scmp.lt.s32.totalorder %s549_s15, %s549_s15 }
  0x1d   :  { %p556_p13 = por %p555_p12, %p554_p11 }
  0x1f   :  { %p557_p0 = pnand %p556_p13, %p550_p10 }
  0x21   :  { %560 = shalt.err (!%p557_p0)
}
  0x22   :  { %51 = dma.hbm_to_vmem [thread:$0]  %s734_s3, 2048, %s46_s11, [#allocation6], %s610_s27, %s610_s27, %s611_s28  }
  0x23   :  { %s614_s17 = smov [#allocation8]  }
  0x24   :  { %s59_s18 = sshll.u32 %s614_s17, 4  ;;  %s60_s18 = int_to_ptr.vmem [resolvable:$true] %s59_s18 }
  0x25   :  { %s569_s19 = scalar_lea.vmem %s60_s18, 2048  ;;  %p574_p2 = scmp.lt.s32.totalorder %s60_s18, %s60_s18 }
  0x26   :  { %p570_p1 = scmp.ne.s32.totalorder %s60_s18, %s569_s19  ;;  %p575_p3 = scmp.lt.s32.totalorder %s569_s19, %s569_s19 }
  0x28   :  { %p576_p4 = por %p575_p3, %p574_p2 }
  0x2a   :  { %p577_p5 = pnand %p576_p4, %p570_p1 }
  0x2c   :  { %580 = shalt.err (!%p577_p5)
}
  0x2d   :  { %65 = dma.hbm_to_vmem [thread:$0]  %s736_s5, 2048, %s60_s18, [#allocation9], %s610_s27, %s610_s27, %s611_s28  }
  0x2e   :  { %601 = dma.done.wait [#allocation3], 128  }
  0x2f   :  { %602 = vsyncadd [#allocation3], 4294967168 }
  0x30   :  { %603 = dma.done.wait [#allocation6], 2304  }
  0x31   :  { %604 = vsyncadd [#allocation6], 4294964992 }
  0x32   :  { %605 = dma.done.wait [#allocation9], 2048  }
  0x33   :  { %606 = vsyncadd [#allocation9], 4294965248  ;;  %v615_v0 = vmov 0.0   ;;  %vm616_vm0 = vmmov 0   ;;  %v82_v1 = vld [vmem:[#allocation5 + $0x8] sm:$0xff]  ;;  %v81_v2 = vld [vmem:[#allocation5] sm:$0xff] }
  0x34   :  { %411 = vmatprep.subr.mxu0 %v615_v0  ;;  %415 = vmatprep.mubr.msk.f32.mxu0 %vm616_vm0, %v615_v0  ;;  %v80_v3 = vld [vmem:[#allocation2] sm:$0xff]  ;;  %vm90_vm1 = vcmask 130048   ;;  %v180_v4 = vld [vmem:[#allocation7 + $0x78] sm:$0xff]  ;;  %v179_v5 = vld [vmem:[#allocation7 + $0x70] sm:$0xff]  ;;  %s617_s24 = smov [#allocation10]  }
  0x35   :  { %418 = vmatprep.subr.mxu1 %v615_v0  ;;  %450 = vmatprep.mubr.msk.f32.mxu1 %vm616_vm0, %v615_v0  ;;  %v178_v6 = vld [vmem:[#allocation7 + $0x68] sm:$0xff]  ;;  %v177_v7 = vld [vmem:[#allocation7 + $0x60] sm:$0xff]  ;;  %v176_v8 = vld [vmem:[#allocation7 + $0x58] sm:$0xff]  ;;  %s359_s25 = sshll.u32 %s617_s24, 4  ;;  %s360_s25 = int_to_ptr.vmem [resolvable:$true] %s359_s25 }
  0x36   :  { %412 = vmatpush3.msra.mxu0 %v82_v1  ;;  %419 = vmatpush3.msra.mxu1 %v180_v4  ;;  %v175_v9 = vld [vmem:[#allocation7 + $0x50] sm:$0xff]  ;;  %v174_v10 = vld [vmem:[#allocation7 + $0x48] sm:$0xff]  ;;  %v173_v11 = vld [vmem:[#allocation7 + $0x40] sm:$0xff]  ;;  %s581_s26 = scalar_lea.vmem %s360_s25, 128  ;;  %p586_p7 = scmp.lt.s32.totalorder %s360_s25, %s360_s25 }
  0x37   :  { %413 = vmatprep.subr.mxu0 %v615_v0  ;;  %420 = vmatprep.subr.mxu1 %v615_v0  ;;  %v172_v12 = vld [vmem:[#allocation7 + $0x38] sm:$0xff]  ;;  %v171_v13 = vld [vmem:[#allocation7 + $0x30] sm:$0xff]  ;;  %v170_v14 = vld [vmem:[#allocation7 + $0x28] sm:$0xff]  ;;  %p582_p6 = scmp.ne.s32.totalorder %s360_s25, %s581_s26  ;;  %p587_p8 = scmp.lt.s32.totalorder %s581_s26, %s581_s26 }
  0x38   :  { %414 = vmatpush3.msra.mxu0 %v81_v2  ;;  %421 = vmatpush3.msra.mxu1 %v179_v5  ;;  %v169_v15 = vld [vmem:[#allocation7 + $0x20] sm:$0xff]  ;;  %v168_v16 = vld [vmem:[#allocation7 + $0x18] sm:$0xff]  ;;  %v167_v17 = vld [vmem:[#allocation7 + $0x10] sm:$0xff] }
  0x39   :  { %416 = vmatmul.mubr.msk.f32.vlgmr.msra.gmra.mxu0 %vm90_vm1, %v80_v3  ;;  %422 = vmatprep.subr.mxu1 %v615_v0  ;;  %v166_v18 = vld [vmem:[#allocation7 + $0x8] sm:$0xff]  ;;  %v165_v19 = vld [vmem:[#allocation7] sm:$0xff]  ;;  %v274_v20 = vld [vmem:[#allocation8 + $0x78] sm:$0xff]  ;;  %p588_p9 = por %p587_p8, %p586_p7 }
  0x3a   :  { %453 = vmatprep.subr.mxu0 %v615_v0  ;;  %423 = vmatpush3.msra.mxu1 %v178_v6  ;;  %v273_v21 = vld [vmem:[#allocation8 + $0x70] sm:$0xff]  ;;  %v272_v22 = vld [vmem:[#allocation8 + $0x68] sm:$0xff]  ;;  %v271_v23 = vld [vmem:[#allocation8 + $0x60] sm:$0xff] }
  0x3b   :  { %485 = vmatprep.mubr.msk.f32.mxu0 %vm616_vm0, %v615_v0  ;;  %424 = vmatprep.subr.mxu1 %v615_v0  ;;  %v270_v24 = vld [vmem:[#allocation8 + $0x58] sm:$0xff]  ;;  %v269_v25 = vld [vmem:[#allocation8 + $0x50] sm:$0xff]  ;;  %v268_v26 = vld [vmem:[#allocation8 + $0x48] sm:$0xff]  ;;  %p589_p10 = pnand %p588_p9, %p582_p6 }
  0x3c   :  { %425 = vmatpush3.msra.mxu1 %v177_v7  ;;  %454 = vmatpush3.msra.mxu0 %v274_v20  ;;  %v370_v27 = vld [vmem:[%s733_s2] ss:$0 sm:$0xff]  ;;  %v267_v32 = vld [vmem:[#allocation8 + $0x40] sm:$0xff]  ;;  %v266_v33 = vld [vmem:[#allocation8 + $0x38] sm:$0xff] }
  0x3d   :  { %426 = vmatprep.subr.mxu1 %v615_v0  ;;  %455 = vmatprep.subr.mxu0 %v615_v0  ;;  %v265_v34 = vld [vmem:[#allocation8 + $0x30] sm:$0xff]  ;;  %v264_v35 = vld [vmem:[#allocation8 + $0x28] sm:$0xff]  ;;  %v263_v36 = vld [vmem:[#allocation8 + $0x20] sm:$0xff] }
  0x3e   :  { %427 = vmatpush3.msra.mxu1 %v176_v8  ;;  %456 = vmatpush3.msra.mxu0 %v273_v21  ;;  %v262_v37 = vld [vmem:[#allocation8 + $0x18] sm:$0xff]  ;;  %v261_v38 = vld [vmem:[#allocation8 + $0x10] sm:$0xff]  ;;  %v260_v39 = vld [vmem:[#allocation8 + $0x8] sm:$0xff] }
  0x3f   :  { %428 = vmatprep.subr.mxu1 %v615_v0  ;;  %457 = vmatprep.subr.mxu0 %v615_v0  ;;  %v259_v40 = vld [vmem:[#allocation8] sm:$0xff]  ;;  %v372_v41 = vld [vmem:[%s735_s4] ss:$0 sm:$0xff] }
  0x40   :  { %429 = vmatpush3.msra.mxu1 %v175_v9  ;;  %458 = vmatpush3.msra.mxu0 %v272_v22  ;;  %v373_v46 = vld [vmem:[%s737_s6] ss:$0 sm:$0xff] }
  0x41   :  { %430 = vmatprep.subr.mxu1 %v615_v0  ;;  %459 = vmatprep.subr.mxu0 %v615_v0 }
  0x42   :  { %431 = vmatpush3.msra.mxu1 %v174_v10  ;;  %460 = vmatpush3.msra.mxu0 %v271_v23 }
  0x43   :  { %432 = vmatprep.subr.mxu1 %v615_v0  ;;  %461 = vmatprep.subr.mxu0 %v615_v0 }
  0x44   :  { %433 = vmatpush3.msra.mxu1 %v173_v11  ;;  %462 = vmatpush3.msra.mxu0 %v270_v24 }
  0x45   :  { %434 = vmatprep.subr.mxu1 %v615_v0  ;;  %463 = vmatprep.subr.mxu0 %v615_v0 }
  0x46   :  { %435 = vmatpush3.msra.mxu1 %v172_v12  ;;  %464 = vmatpush3.msra.mxu0 %v269_v25 }
  0x47   :  { %436 = vmatprep.subr.mxu1 %v615_v0  ;;  %465 = vmatprep.subr.mxu0 %v615_v0 }
  0x48   :  { %437 = vmatpush3.msra.mxu1 %v171_v13  ;;  %466 = vmatpush3.msra.mxu0 %v268_v26 }
  0x49   :  { %438 = vmatprep.subr.mxu1 %v615_v0  ;;  %467 = vmatprep.subr.mxu0 %v615_v0 }
  0x4a   :  { %439 = vmatpush3.msra.mxu1 %v170_v14  ;;  %468 = vmatpush3.msra.mxu0 %v267_v32 }
  0x4b   :  { %440 = vmatprep.subr.mxu1 %v615_v0  ;;  %469 = vmatprep.subr.mxu0 %v615_v0 }
  0x4c   :  { %441 = vmatpush3.msra.mxu1 %v169_v15  ;;  %470 = vmatpush3.msra.mxu0 %v266_v33 }
  0x4d   :  { %442 = vmatprep.subr.mxu1 %v615_v0  ;;  %471 = vmatprep.subr.mxu0 %v615_v0 }
  0x4e   :  { %443 = vmatpush3.msra.mxu1 %v168_v16  ;;  %472 = vmatpush3.msra.mxu0 %v265_v34 }
  0x4f   :  { %444 = vmatprep.subr.mxu1 %v615_v0  ;;  %473 = vmatprep.subr.mxu0 %v615_v0 }
  0x50   :  { %445 = vmatpush3.msra.mxu1 %v167_v17  ;;  %474 = vmatpush3.msra.mxu0 %v264_v35 }
  0x51   :  { %446 = vmatprep.subr.mxu1 %v615_v0  ;;  %475 = vmatprep.subr.mxu0 %v615_v0 }
  0x52   :  { %447 = vmatpush3.msra.mxu1 %v166_v18  ;;  %476 = vmatpush3.msra.mxu0 %v263_v36 }
  0x53   :  { %448 = vmatprep.subr.mxu1 %v615_v0  ;;  %477 = vmatprep.subr.mxu0 %v615_v0 }
  0x54   :  { %449 = vmatpush3.msra.mxu1 %v165_v19  ;;  %478 = vmatpush3.msra.mxu0 %v262_v37 }
  0x55   :  { %479 = vmatprep.subr.mxu0 %v615_v0 }
  0x56   :  { %480 = vmatpush3.msra.mxu0 %v261_v38 }
  0x57   :  { %481 = vmatprep.subr.mxu0 %v615_v0 }
  0x58   :  { %482 = vmatpush3.msra.mxu0 %v260_v39 }
  0x59   :  { %483 = vmatprep.subr.mxu0 %v615_v0 }
  0x5a   :  { %484 = vmatpush3.msra.mxu0 %v259_v40 }
  0xf9   :  { %v160_v28 = vpop.f32.mrf.mxu0 }
  0xfa   :  { %v161_v29 = vadd.f32 %v370_v27, %v160_v28 }
  0xfb   :  { %v417_v30 = vpop.f32.mrf.mxu0 }
  0xfc   :  { %497 = vtanh.f32 %v161_v29 }
 0x109   :  { %v498_v31 = vpop.eup %497 }
 0x10a   :  { %451 = vmatmul.mubr.f32.vlgmr.msra.gmra.mxu1 %v498_v31 }
 0x1ca   :  { %v254_v42 = vpop.f32.mrf.mxu1 }
 0x1cb   :  { %v255_v43 = vadd.f32 %v372_v41, %v254_v42 }
 0x1cc   :  { %v452_v44 = vpop.f32.mrf.mxu1 }
 0x1cd   :  { %499 = vtanh.f32 %v255_v43 }
 0x1da   :  { %v500_v45 = vpop.eup %499 }
 0x1db   :  { %486 = vmatmul.mubr.f32.vlgmr.msra.gmra.mxu0 %v500_v45 }
 0x29b   :  { %v348_v47 = vpop.f32.mrf.mxu0 }
 0x29c   :  { %v349_v48 = vadd.f32 %v373_v46, %v348_v47 }
 0x29d   :  { %v487_v49 = vpop.f32.mrf.mxu0 }
 0x29e   :  { %352 = vst [vmem:[#allocation10] sm:$0xff] %v349_v48 }
 0x29f   :  { %592 = shalt.err (!%p589_p10)
}
 0x2a0   :  { %362 = dma.vmem_to_hbm [thread:$0]  %s360_s25, 128, %s738_s7, [#allocation4]  }
 0x2a1   :  { %607 = dma.done.wait [#allocation4], 128  }
 0x2a2   :  { %608 = vsyncadd [#allocation4], 4294967168 }
 0x2a3   :  { %366 = vsyncpa [#allocation3], 1 }
 0x2a4   :  { %367 = vsyncpa [#allocation6], 1 }
 0x2a5   :  { %368 = vsyncpa [#allocation9], 1 }
 0x2a6   :  { %369 = vsyncpa [#allocation4], 1 }

</bundles_post_ra>
